<compile_context>
chip_gen: v7x
topology: tpu7x:2x2x1
jax: 0.10.0
libtpu: 0.0.40
codegen_flags: <defaults>
</compile_context>

<pallas_src>
import functools

import jax
import jax.numpy as jnp
from jax import lax
from jax.experimental import pallas as pl
from jax.experimental.pallas import tpu as pltpu


# ---------------------------------------------------------------------------
# Kernel
# ---------------------------------------------------------------------------
def _resize_pad_kernel(rsel_ref, cselT_ref, x_ref, o_ref, *, unroll):
    """Fused nearest-resize + zero-pad via two one-hot selection matmuls.

    rsel_ref:  (size, H)  bf16 one-hot row selector; pad rows are all-zero.
    cselT_ref: (W, size)  bf16 one-hot column selector (transposed); pad cols zero.
    x_ref:     (B, H, W)  B input planes.
    o_ref:     (B, size, size)
    Per plane: out = (rsel @ x) @ cselT, f32 accumulation on the MXU.
    """
    B = x_ref.shape[0]
    cdt = cselT_ref.dtype
    rsel = rsel_ref[...]
    cselT = cselT_ref[...]

    def body(b, carry):
        x_p = x_ref[b].astype(cdt)                                     # (H, W)
        tmp = jnp.dot(rsel, x_p, preferred_element_type=jnp.float32)   # (size, W)
        # One-hot gather => values are exact bf16 values (or 0); cast is lossless.
        tmp = tmp.astype(cdt)
        o_ref[b] = jnp.dot(tmp, cselT,
                           preferred_element_type=jnp.float32).astype(o_ref.dtype)
        return carry

    lax.fori_loop(0, B, body, 0, unroll=unroll)


# ---------------------------------------------------------------------------
# Generation-aware blocking
# ---------------------------------------------------------------------------
def _round_up(n, m):
    return -(-n // m) * m


def _tpu_info():
    """Return (vmem_bytes_per_core, tensorcores_per_device) with safe fallbacks."""
    kind = ""
    try:
        kind = jax.devices()[0].device_kind.lower()
    except Exception:
        pass
    if "v7" in kind:
        vmem, num_tc = 64 << 20, 2
    elif "v6" in kind:
        vmem, num_tc = 128 << 20, 1
    elif "v5p" in kind or "v5 p" in kind:
        vmem, num_tc = 128 << 20, 2
    elif "v5" in kind:                       # v5e / v5 lite
        vmem, num_tc = 128 << 20, 1
    elif "v4" in kind:
        vmem, num_tc = 128 << 20, 2
    else:
        vmem, num_tc = 64 << 20, 1           # conservative default
    try:
        vmem = int(pltpu.get_tpu_info().vmem_capacity_bytes)
    except Exception:
        pass
    return vmem, num_tc


def _pick_blocking(nc, H, W, size, in_item, out_item, compute_item):
    """Choose (block_b, grid_steps, unroll, vmem_limit_bytes)."""
    vmem_bytes, num_tc = _tpu_info()

    # VMEM footprints, padded to the (8, 128) tile layout (conservative).
    plane_in = _round_up(H, 8) * _round_up(W, 128) * in_item
    plane_out = _round_up(size, 8) * _round_up(size, 128) * out_item
    sel = (_round_up(size, 8) * _round_up(H, 128)
           + _round_up(W, 8) * _round_up(size, 128)) * compute_item
    # Live intermediates of one fori_loop iteration: bf16 copy of the plane,
    # f32 + bf16 (size, W) temp, f32 (size, size) result before the output cast.
    per_iter = (_round_up(H, 8) * _round_up(W, 128) * compute_item
                + _round_up(size, 8) * _round_up(W, 128) * (4 + compute_item)
                + _round_up(size, 8) * _round_up(size, 128) * 4)

    unroll = 4
    inter = unroll * per_iter
    # Double-buffered in/out blocks get ~55% of physical VMEM minus resident
    # selectors, intermediates and compiler-scratch headroom.
    budget = int(vmem_bytes * 0.55) - (8 << 20) - inter - 2 * sel
    per_plane = 2 * (plane_in + plane_out)          # double-buffered in + out
    budget = max(budget, per_plane)                 # always allow >= 1 plane
    b_fit = max(1, min(256, budget // per_plane))

    min_steps = -(-nc // b_fit)
    if num_tc >= 2:
        want = 4 if nc >= 4 else (2 if nc >= 2 else 1)
    else:
        want = 2 if nc >= 2 else 1                  # grid >= 2 for DMA overlap
    steps = max(min_steps, want)
    if num_tc >= 2 and steps > 1 and steps % 2:
        steps += 1                                  # balanced 2-TC split
    block_b = -(-nc // steps)
    unroll = max(1, min(unroll, block_b))

    used = 2 * block_b * (plane_in + plane_out) + 2 * sel + unroll * per_iter
    vmem_limit = min(int(vmem_bytes * 0.9), max(32 << 20, used + (16 << 20)))
    return block_b, steps, unroll, int(vmem_limit)


# ---------------------------------------------------------------------------
# Wrapper
# ---------------------------------------------------------------------------
def _resize_and_pad_impl(x, rnd, pad_top, pad_left, *, size,
                         compute_dtype=jnp.bfloat16, output_dtype=None):
    """Nearest-resize x (N,C,H,W) -> (N,C,rnd,rnd), place at (pad_top, pad_left)
    inside a zero (N,C,size,size) canvas. rnd/pad_* may be traced scalars."""
    N, C, H, W = x.shape
    out_dtype = jnp.dtype(output_dtype) if output_dtype is not None else x.dtype

    rnd = jnp.asarray(rnd, jnp.int32)
    pad_top = jnp.asarray(pad_top, jnp.int32)
    pad_left = jnp.asarray(pad_left, jnp.int32)

    # Row selector (size, H): one-hot nearest gather (PyTorch 'nearest':
    # src = floor(dst * in / out)); rows in the pad region are all-zero.
    oy = jnp.arange(size)
    valid_r = (oy >= pad_top) & (oy < pad_top + rnd)
    src_r = jnp.clip(((oy - pad_top) * H) // rnd, 0, H - 1)
    rsel = (jax.nn.one_hot(src_r, H, dtype=compute_dtype)
            * valid_r[:, None].astype(compute_dtype))

    # Column selector, transposed: (W, size).
    ox = jnp.arange(size)
    valid_c = (ox >= pad_left) & (ox < pad_left + rnd)
    src_c = jnp.clip(((ox - pad_left) * W) // rnd, 0, W - 1)
    cselT = (jax.nn.one_hot(src_c, W, dtype=compute_dtype)
             * valid_c[:, None].astype(compute_dtype)).T

    nc = N * C
    in_item = jnp.dtype(x.dtype).itemsize
    out_item = jnp.dtype(out_dtype).itemsize
    compute_item = jnp.dtype(compute_dtype).itemsize
    block_b, steps, unroll, vmem_limit = _pick_blocking(
        nc, H, W, size, in_item, out_item, compute_item)
    ncp = steps * block_b

    x_flat = x.reshape(nc, H, W)
    if ncp != nc:
        x_flat = jnp.pad(x_flat, ((0, ncp - nc), (0, 0), (0, 0)))

    flops = 2 * ncp * size * W * (H + size)
    bytes_accessed = (ncp * (H * W * in_item + size * size * out_item)
                      + (size * H + W * size) * compute_item)

    kernel = functools.partial(_resize_pad_kernel, unroll=unroll)
    out = pl.pallas_call(
        kernel,
        out_shape=jax.ShapeDtypeStruct((ncp, size, size), out_dtype),
        grid=(steps,),
        in_specs=[
            pl.BlockSpec((size, H), lambda i: (0, 0)),     # resident selector
            pl.BlockSpec((W, size), lambda i: (0, 0)),     # resident selector
            pl.BlockSpec((block_b, H, W), lambda i: (i, 0, 0)),
        ],
        out_specs=pl.BlockSpec((block_b, size, size), lambda i: (i, 0, 0)),
        compiler_params=pltpu.CompilerParams(
            dimension_semantics=("parallel",),
            vmem_limit_bytes=vmem_limit),
        cost_estimate=pl.CostEstimate(
            flops=flops, transcendentals=0, bytes_accessed=bytes_accessed),
    )(rsel, cselT, x_flat)

    return out[:nc].reshape(N, C, size, size)


_resize_and_pad = jax.jit(
    _resize_and_pad_impl,
    static_argnames=("size", "compute_dtype", "output_dtype"))


@functools.partial(jax.jit, static_argnames=("size", "output_dtype"))
def _randomized_forward(x, key, *, size, output_dtype=None):
    """Random draws (device scalars, no host sync) + fused resize/pad kernel."""
    W = x.shape[3]
    k_rnd, k_left, k_top = jax.random.split(key, 3)
    if size > W:
        rnd = jax.random.randint(k_rnd, (), W, size, dtype=jnp.int32)
    else:
        # Degenerate config: torch.randint(W, size) would reject an empty range.
        rnd = jnp.int32(W)
    pad_w = jnp.int32(size) - rnd
    hi = jnp.maximum(pad_w, 1)       # offsets in [0, pad_w); 0 when pad_w == 0
    # torch.randint / jax.random.randint are both exclusive of the upper bound.
    pad_left = jax.random.randint(k_left, (), 0, hi, dtype=jnp.int32)
    pad_top = jax.random.randint(k_top, (), 0, hi, dtype=jnp.int32)
    return _resize_and_pad_impl(x, rnd, pad_top, pad_left, size=size,
                                output_dtype=output_dtype)


class Randomization:
    """JAX/Pallas port of the PyTorch Randomization module (no parameters).

    output_dtype=None keeps x.dtype (torch semantics); pass jnp.bfloat16 to
    halve output HBM traffic (the data is already bf16-rounded on the MXU path).
    """

    def __init__(self, p=0.5, size=330, output_dtype=None):
        self.p = p
        self.size = size
        self.output_dtype = output_dtype

    def __call__(self, x, key):
        k_coin, k_rest = jax.random.split(key)
        # The coin flip changes the output *shape* (identity vs size x size), so
        # it must be a host-side decision (same as torch's tensor-in-if usage).
        coin = float(jax.random.uniform(k_coin, ()))
        if coin < self.p:
            return _randomized_forward(x, k_rest, size=self.size,
                                       output_dtype=self.output_dtype)
        return x


# ---------------------------------------------------------------------------
# Pure-JAX reference + test
# ---------------------------------------------------------------------------
def _reference(x, rnd, pad_top, pad_left, size):
    """Pure-JAX reference: nearest resize (PyTorch indexing) + constant pad."""
    N, C, H, W = x.shape
    iy = (jnp.arange(rnd) * H) // rnd
    ix = (jnp.arange(rnd) * W) // rnd
    resized = x[:, :, iy, :][:, :, :, ix]
    out = jnp.zeros((N, C, size, size), x.dtype)
    return out.at[:, :, pad_top:pad_top + rnd, pad_left:pad_left + rnd].set(resized)


if __name__ == "__main__":
    key = jax.random.PRNGKey(0)
    k_x, k_fwd = jax.random.split(key)

    # Small shapes consistent with the module: NCHW input, size > W.
    N, C, H, W = 2, 4, 16, 16
    SIZE = 24
    x = jax.random.normal(k_x, (N, C, H, W), dtype=jnp.float32)

    # Correctness of the Pallas hot path for fixed random draws.
    rnd, pad_top, pad_left = 20, 3, 2
    got = _resize_and_pad(x, rnd, pad_top, pad_left, size=SIZE)
    jax.block_until_ready(got)
    assert got.shape == (N, C, SIZE, SIZE)

    # Exact check: with bf16 one-hot selectors the kernel returns exactly the
    # bf16-rounded input values (pure gather), accumulated in f32.
    want_bf16 = _reference(x.astype(jnp.bfloat16).astype(jnp.float32),
                           rnd, pad_top, pad_left, SIZE)
    assert jnp.allclose(got, want_bf16, atol=1e-6), "mismatch vs bf16 gather ref"

    # Loose check against the full-precision PyTorch-equivalent reference
    # (only difference is bf16 rounding of input values on the MXU path).
    want_f32 = _reference(x, rnd, pad_top, pad_left, SIZE)
    assert jnp.allclose(got, want_f32, rtol=2e-2, atol=2e-2), "mismatch vs f32 ref"

    # Full module forward (p=1.0 so the Pallas path runs deterministically).
    mod = Randomization(p=1.0, size=SIZE)
    out = mod(x, k_fwd)
    jax.block_until_ready(out)
    assert out.shape == (N, C, SIZE, SIZE)

    print("KERNEL_OK")
</pallas_src>

<mosaic_0001>
module attributes {stable_mosaic.version = 11 : i64} {
  func.func @_resize_pad_kernel(%arg0: i32, %arg1: memref<24x16xbf16, #tpu.memory_space<vmem>>, %arg2: memref<16x24xbf16, #tpu.memory_space<vmem>>, %arg3: memref<4x16x16xf32, #tpu.memory_space<vmem>>, %arg4: memref<4x24x24xf32, #tpu.memory_space<vmem>>) attributes {dimension_semantics = [#tpu.dimension_semantics<parallel>], iteration_bounds = array<i64: 2>, scalar_prefetch = 0 : i64, scratch_operands = 0 : i64, tpu.core_type = #tpu.core_type<tc>, window_params = [{pipeline_mode = #tpu.pipeline_mode<synchronous>, transform_indices = @transform_0, window_bounds = array<i64: 24, 16>}, {pipeline_mode = #tpu.pipeline_mode<synchronous>, transform_indices = @transform_1, window_bounds = array<i64: 16, 24>}, {transform_indices = @transform_2, window_bounds = array<i64: 4, 16, 16>}, {transform_indices = @transform_3, window_bounds = array<i64: 4, 24, 24>}]} {
    %c0 = arith.constant 0 : index
    %c0_0 = arith.constant 0 : index
    %0 = vector.load %arg1[%c0, %c0_0] : memref<24x16xbf16, #tpu.memory_space<vmem>>, vector<24x16xbf16>
    %c0_1 = arith.constant 0 : index
    %c0_2 = arith.constant 0 : index
    %1 = vector.load %arg2[%c0_1, %c0_2] : memref<16x24xbf16, #tpu.memory_space<vmem>>, vector<16x24xbf16>
    %c0_i32 = arith.constant 0 : i32
    %2 = arith.index_cast %c0_i32 : i32 to index
    %c0_3 = arith.constant 0 : index
    %c0_4 = arith.constant 0 : index
    %3 = vector.load %arg3[%2, %c0_3, %c0_4] : memref<4x16x16xf32, #tpu.memory_space<vmem>>, vector<1x16x16xf32>
    %4 = vector.shape_cast %3 : vector<1x16x16xf32> to vector<16x16xf32>
    %5 = arith.truncf %4 : vector<16x16xf32> to vector<16x16xbf16>
    %cst = arith.constant dense<0.000000e+00> : vector<24x16xf32>
    %6 = tpu.matmul %0, %5, %cst {dimension_numbers = #tpu.dot_dimension_numbers<[1], [0], [0], [1], [0, 0, 1, 1], [], []>} : vector<24x16xbf16>, vector<16x16xbf16>, vector<24x16xf32> -> vector<24x16xf32>
    %7 = arith.truncf %6 : vector<24x16xf32> to vector<24x16xbf16>
    %cst_5 = arith.constant dense<0.000000e+00> : vector<24x24xf32>
    %8 = tpu.matmul %7, %1, %cst_5 {dimension_numbers = #tpu.dot_dimension_numbers<[1], [0], [0], [1], [0, 0, 1, 1], [], []>} : vector<24x16xbf16>, vector<16x24xbf16>, vector<24x24xf32> -> vector<24x24xf32>
    %9 = arith.index_cast %c0_i32 : i32 to index
    %c0_6 = arith.constant 0 : index
    %c0_7 = arith.constant 0 : index
    %10 = vector.load %arg4[%9, %c0_6, %c0_7] : memref<4x24x24xf32, #tpu.memory_space<vmem>>, vector<1x24x24xf32>
    %11 = vector.shape_cast %10 : vector<1x24x24xf32> to vector<24x24xf32>
    %12 = vector.shape_cast %8 : vector<24x24xf32> to vector<1x24x24xf32>
    tpu.vector_store %arg4[%9, %c0_6, %c0_7], %12 {strides = array<i32>} : memref<4x24x24xf32, #tpu.memory_space<vmem>>, vector<1x24x24xf32>,
    %c1_i32 = arith.constant 1 : i32
    %13 = arith.index_cast %c1_i32 : i32 to index
    %c0_8 = arith.constant 0 : index
    %c0_9 = arith.constant 0 : index
    %14 = vector.load %arg3[%13, %c0_8, %c0_9] : memref<4x16x16xf32, #tpu.memory_space<vmem>>, vector<1x16x16xf32>
    %15 = vector.shape_cast %14 : vector<1x16x16xf32> to vector<16x16xf32>
    %16 = arith.truncf %15 : vector<16x16xf32> to vector<16x16xbf16>
    %cst_10 = arith.constant dense<0.000000e+00> : vector<24x16xf32>
    %17 = tpu.matmul %0, %16, %cst_10 {dimension_numbers = #tpu.dot_dimension_numbers<[1], [0], [0], [1], [0, 0, 1, 1], [], []>} : vector<24x16xbf16>, vector<16x16xbf16>, vector<24x16xf32> -> vector<24x16xf32>
    %18 = arith.truncf %17 : vector<24x16xf32> to vector<24x16xbf16>
    %cst_11 = arith.constant dense<0.000000e+00> : vector<24x24xf32>
    %19 = tpu.matmul %18, %1, %cst_11 {dimension_numbers = #tpu.dot_dimension_numbers<[1], [0], [0], [1], [0, 0, 1, 1], [], []>} : vector<24x16xbf16>, vector<16x24xbf16>, vector<24x24xf32> -> vector<24x24xf32>
    %20 = arith.index_cast %c1_i32 : i32 to index
    %c0_12 = arith.constant 0 : index
    %c0_13 = arith.constant 0 : index
    %21 = vector.load %arg4[%20, %c0_12, %c0_13] : memref<4x24x24xf32, #tpu.memory_space<vmem>>, vector<1x24x24xf32>
    %22 = vector.shape_cast %21 : vector<1x24x24xf32> to vector<24x24xf32>
    %23 = vector.shape_cast %19 : vector<24x24xf32> to vector<1x24x24xf32>
    tpu.vector_store %arg4[%20, %c0_12, %c0_13], %23 {strides = array<i32>} : memref<4x24x24xf32, #tpu.memory_space<vmem>>, vector<1x24x24xf32>,
    %c2_i32 = arith.constant 2 : i32
    %24 = arith.index_cast %c2_i32 : i32 to index
    %c0_14 = arith.constant 0 : index
    %c0_15 = arith.constant 0 : index
    %25 = vector.load %arg3[%24, %c0_14, %c0_15] : memref<4x16x16xf32, #tpu.memory_space<vmem>>, vector<1x16x16xf32>
    %26 = vector.shape_cast %25 : vector<1x16x16xf32> to vector<16x16xf32>
    %27 = arith.truncf %26 : vector<16x16xf32> to vector<16x16xbf16>
    %cst_16 = arith.constant dense<0.000000e+00> : vector<24x16xf32>
    %28 = tpu.matmul %0, %27, %cst_16 {dimension_numbers = #tpu.dot_dimension_numbers<[1], [0], [0], [1], [0, 0, 1, 1], [], []>} : vector<24x16xbf16>, vector<16x16xbf16>, vector<24x16xf32> -> vector<24x16xf32>
    %29 = arith.truncf %28 : vector<24x16xf32> to vector<24x16xbf16>
    %cst_17 = arith.constant dense<0.000000e+00> : vector<24x24xf32>
    %30 = tpu.matmul %29, %1, %cst_17 {dimension_numbers = #tpu.dot_dimension_numbers<[1], [0], [0], [1], [0, 0, 1, 1], [], []>} : vector<24x16xbf16>, vector<16x24xbf16>, vector<24x24xf32> -> vector<24x24xf32>
    %31 = arith.index_cast %c2_i32 : i32 to index
    %c0_18 = arith.constant 0 : index
    %c0_19 = arith.constant 0 : index
    %32 = vector.load %arg4[%31, %c0_18, %c0_19] : memref<4x24x24xf32, #tpu.memory_space<vmem>>, vector<1x24x24xf32>
    %33 = vector.shape_cast %32 : vector<1x24x24xf32> to vector<24x24xf32>
    %34 = vector.shape_cast %30 : vector<24x24xf32> to vector<1x24x24xf32>
    tpu.vector_store %arg4[%31, %c0_18, %c0_19], %34 {strides = array<i32>} : memref<4x24x24xf32, #tpu.memory_space<vmem>>, vector<1x24x24xf32>,
    %c3_i32 = arith.constant 3 : i32
    %35 = arith.index_cast %c3_i32 : i32 to index
    %c0_20 = arith.constant 0 : index
    %c0_21 = arith.constant 0 : index
    %36 = vector.load %arg3[%35, %c0_20, %c0_21] : memref<4x16x16xf32, #tpu.memory_space<vmem>>, vector<1x16x16xf32>
    %37 = vector.shape_cast %36 : vector<1x16x16xf32> to vector<16x16xf32>
    %38 = arith.truncf %37 : vector<16x16xf32> to vector<16x16xbf16>
    %cst_22 = arith.constant dense<0.000000e+00> : vector<24x16xf32>
    %39 = tpu.matmul %0, %38, %cst_22 {dimension_numbers = #tpu.dot_dimension_numbers<[1], [0], [0], [1], [0, 0, 1, 1], [], []>} : vector<24x16xbf16>, vector<16x16xbf16>, vector<24x16xf32> -> vector<24x16xf32>
    %40 = arith.truncf %39 : vector<24x16xf32> to vector<24x16xbf16>
    %cst_23 = arith.constant dense<0.000000e+00> : vector<24x24xf32>
    %41 = tpu.matmul %40, %1, %cst_23 {dimension_numbers = #tpu.dot_dimension_numbers<[1], [0], [0], [1], [0, 0, 1, 1], [], []>} : vector<24x16xbf16>, vector<16x24xbf16>, vector<24x24xf32> -> vector<24x24xf32>
    %42 = arith.index_cast %c3_i32 : i32 to index
    %c0_24 = arith.constant 0 : index
    %c0_25 = arith.constant 0 : index
    %43 = vector.load %arg4[%42, %c0_24, %c0_25] : memref<4x24x24xf32, #tpu.memory_space<vmem>>, vector<1x24x24xf32>
    %44 = vector.shape_cast %43 : vector<1x24x24xf32> to vector<24x24xf32>
    %45 = vector.shape_cast %41 : vector<24x24xf32> to vector<1x24x24xf32>
    tpu.vector_store %arg4[%42, %c0_24, %c0_25], %45 {strides = array<i32>} : memref<4x24x24xf32, #tpu.memory_space<vmem>>, vector<1x24x24xf32>,
    %c4_i32 = arith.constant 4 : i32
    return
  }
  func.func @transform_0(%arg0: i32) -> (i32, i32) {
    %c0_i32 = arith.constant 0 : i32
    %c0_i32_0 = arith.constant 0 : i32
    %c0_i32_1 = arith.constant 0 : i32
    return %c0_i32, %c0_i32_0 : i32, i32
  }
  func.func @transform_1(%arg0: i32) -> (i32, i32) {
    %c0_i32 = arith.constant 0 : i32
    %c0_i32_0 = arith.constant 0 : i32
    %c0_i32_1 = arith.constant 0 : i32
    return %c0_i32, %c0_i32_0 : i32, i32
  }
  func.func @transform_2(%arg0: i32) -> (i32, i32, i32) {
    %c0_i32 = arith.constant 0 : i32
    %c0_i32_0 = arith.constant 0 : i32
    %c0_i32_1 = arith.constant 0 : i32
    return %arg0, %c0_i32, %c0_i32_0 : i32, i32, i32
  }
  func.func @transform_3(%arg0: i32) -> (i32, i32, i32) {
    %c0_i32 = arith.constant 0 : i32
    %c0_i32_0 = arith.constant 0 : i32
    %c0_i32_1 = arith.constant 0 : i32
    return %arg0, %c0_i32, %c0_i32_0 : i32, i32, i32
  }
}

</mosaic_0001>

<bundles_post_ra>
// kernel: _resize_and_pad_impl.1
= control target key start
LH: loop header
LB: loop body
LE: loop exit
PB: predicated region body
PF: predicated region fallthrough
CT: control target
= control target key end

     0   :  { %8 = vsyncpa [#allocation3], 0  ;;  %s1270_s0 = inlined_call_operand.vmem [shape: bf16[24,16], index: 0, kind: input, shape index: {}]   ;;  %s1271_s1 = inlined_call_operand.vmem [shape: bf16[16,24], index: 1, kind: input, shape index: {}]   ;;  %s1272_s2 = inlined_call_operand.hbm [shape: f32[8,16,16], index: 2, kind: input, shape index: {}]   ;;  %s1273_s3 = inlined_call_operand.hbm [shape: f32[8,24,24], index: 3, kind: output, shape index: {}]  }
   0x1   :  { %10 = vsyncpa [#allocation3 + $0x1], 0 }
   0x2   :  { %11 = vsyncpa [#allocation4], 0 }
   0x3   :  { %13 = vsyncpa [#allocation4 + $0x1], 0  ;;  %s1055_s12 = smov 0   ;;  %s1057_s13 = smov 0  }
   0x4   :  { %s1059_s14 = smov 0   ;;  %s1061_s15 = smov 0  }
   0x5 LB: > { %s1076_s16 = sadd.s32 4294967295, %s1027_s15   ;;  %s754_s17 = sadd.s32 4294967294, %s1027_s15   ;;  %s1027_s15 = sphi %s1061_s15, %s1286_s15   ;;  %s1023_s14 = sphi %s1059_s14, %s1285_s14   ;;  %s1019_s13 = sphi %s1057_s13, %s1284_s13   ;;  %s1015_s12 = sphi %s1055_s12, %s1283_s12  }
   0x6   : > { %s1080_s18 = sadd.s32 1, %s1027_s15   ;;  %s68_s19 = sadd.s32 1, %s1023_s14 }
   0x7   : > { %s65_s20 = ssub.s32 %s1027_s15, %s1080_s18  ;;  %p75_p0 = scmp.ne.s32.totalorder %s1023_s14, %s1019_s13 }
   0x8   : > { %p66_p1 = scmp.eq.s32.totalorder %s65_s20, 0  ;;  %p76_p2 = scmp.eq.s32.totalorder %s1027_s15, 0 }
   0x9   : > { %p81_p3 = scmp.ne.s32.totalorder %s1019_s13, %s1015_s12  ;;  %p82_p4 = scmp.eq.s32.totalorder %s1076_s16, 0 }
   0xa   : > { %s1092_s21 = scalar_select %p66_p1, %s1023_s14, %s68_s19  }
   0xb   : > { %p1094_p5 = por %p76_p2, %p75_p0  ;;  %p1098_p6 = por %p82_p4, %p81_p3 }
   0xc   : > { %p105_p7 = scmp.eq.s32.totalorder %s1076_s16, 1  ;;  %p111_p8 = scmp.eq.s32.totalorder %s754_s17, 1 }
   0xd   : > { %p890_p10 = scmp.lt.s32.totalorder %s1027_s15, 2  ;;  %s137_s26 = sand.u32 1, %s1023_s14  }
   0xe   : > { %p1105_p11 = por %p105_p7, %p75_p0  ;;  %p1109_p12 = por %p111_p8, %p81_p3 }
   0xf   : > { %s803_s27 = sshll.u32 %s1027_s15, 10  ;;  %s757_s28 = sshll.u32 %s137_s26, 6 }
  0x10   : > { %s1277_s24 = scalar_select %p1105_p11, 1, 0 }
  0x11   : > { %s1278_s25 = scalar_select %p1109_p12, 1, 0 }
  0x12   : > { %s1118_s4 = scalar_lea.hbm %s1272_s2, %s803_s27  ;;  %s141_s5 = scalar_lea.vmem [#allocation2], %s757_s28 }
  0x13   : > { %s149_s6 = sshll.u32 %s141_s5, 4  ;;  %p1122_p13 = pnand %p890_p10, %p1094_p5  ;;  %s1126_s6 = int_to_ptr.vmem [resolvable:$true] %s149_s6 }
  0x14   : > { %s1128_s8 = scalar_lea.sflag [#allocation3], %s137_s26  ;;  %s931_s9 = scalar_lea.hbm %s1118_s4, 1024 }
  0x15   : > { %p932_p0 = scmp.ne.s32.totalorder %s1118_s4, %s931_s9  ;;  %p933_p1 = pneg %p1122_p13 }
  0x16   : > { %s936_s17 = scalar_lea.hbm %s1272_s2, 2048  ;;  %p937_p4 = scmp.lt.u32.totalorder %s1118_s4, %s1272_s2 }
  0x17   : > { %p934_p2 = pnand %p933_p1, %p932_p0  ;;  %p938_p5 = scmp.lt.u32.totalorder %s936_s17, %s931_s9 }
  0x18   : > { %p940_p8 = scmp.lt.u32.totalorder %s931_s9, %s1118_s4 }
  0x19   : > { %p935_p3 = pneg %p934_p2  ;;  %p939_p7 = por %p938_p5, %p937_p4 }
  0x1b   : > { %p941_p10 = por %p940_p8, %p939_p7 }
  0x1d   : > { %p942_p9 = pnand %p941_p10, %p935_p3 }
  0x1f   : > { %945 = shalt.err (!%p942_p9)
}
  0x20   : > { %s946_s22 = scalar_lea.vmem %s1126_s6, 1024  ;;  %s1029_s26 = smov [#allocation2]  }
  0x21   : > { %p947_p0 = scmp.ne.s32.totalorder %s1126_s6, %s946_s22  ;;  %s951_s27 = sshll.u32 %s1029_s26, 4  ;;  %s952_s27 = int_to_ptr.vmem [resolvable:$false] %s951_s27 }
  0x22   : > { %s953_s28 = scalar_lea.vmem %s952_s27, 2048  ;;  %p954_p11 = scmp.lt.s32.totalorder %s1126_s6, %s952_s27 }
  0x23   : > { %p949_p2 = pnand %p947_p0, %p933_p1  ;;  %p955_p4 = scmp.lt.s32.totalorder %s953_s28, %s946_s22 }
  0x25   : > { %p950_p12 = pneg %p949_p2  ;;  %p956_p5 = por %p955_p4, %p954_p11 }
  0x27   : > { %p957_p7 = pnand %p956_p5, %p950_p12 }
  0x29   : > { %960 = shalt.err (!%p957_p7)
}
  0x2a   : > { %s1030_s29 = smov 128   ;;  %s1031_s30 = smov 8  }
  0x2b   : > { %885 = dma.hbm_to_vmem [thread:$0]  (!%p1122_p13), %s1118_s4, 1024, %s1126_s6, %s1128_s8, %s1030_s29, %s1030_s29, %s1031_s30  }
  0x2c   : > { %p761_p9 = scmp.ge.s32.totalorder %s1027_s15, 1  ;;  %p157_p1 = scmp.lt.s32.totalorder %s1027_s15, 3 }
  0x2e   : > { %p158_p3 = pnand %p761_p9, %p157_p1 }
  0x2f   : > { %s1159_s5 = sand.u32 (!%p158_p3), 1, %s1019_s13  }
  0x30   : > { %161 = sbr.rel (%p158_p3) target bundleno = 535 (0x217), region = 32  ;;  %s762_s9 = sshll.u32 (!%p158_p3), %s1159_s5, 6 }
  0x31   : > { %s164_s10 = scalar_lea.sflag (!%p158_p3), [#allocation3], %s1159_s5  ;;  %s167_s11 = scalar_lea.vmem (!%p158_p3), [#allocation2], %s762_s9 }
  0x37   : > { %1006 = dma.done.wait (%p1098_p6), %s164_s10, 1024  }
  0x38   : > { %1008 = vsyncadd (%p1098_p6), %s164_s10, 4294966272  ;;  %v198_v0 = vld [vmem:[%s167_s11] sm:$0xff]  ;;  %v199_v1 = vld [vmem:[%s167_s11 + $0x8] sm:$0xff]  ;;  %vm209_vm0 = vcmask 130048   ;;  %s876_s19 = smul.u32 96, %s1159_s5  ;;  %vm326_vm1 = vcmask 195584  }
  0x39   : > { %v200_v2 = vpack.c.bf16 %v199_v1, %v198_v0  ;;  %v928_v3 = vld [vmem:[%s1270_s0] sm:$0xff]   ;;  %v770_v4 = vld [vmem:[%s167_s11 + $0x10] sm:$0xff]  ;;  %v771_v5 = vld [vmem:[%s167_s11 + $0x18] sm:$0xff]  ;;  %s877_s22 = smul.u32 1536, %s1076_s16  ;;  %s667_s16 = scalar_lea.sflag [#allocation4], %s1159_s5 }
  0x3a   : > { %830 = vmatprep.mubr.msk.bf16.mxu0 %vm209_vm0, %v928_v3  ;;  %v929_v6 = vld [vmem:[%s1270_s0 + $0x8] ss:$0 sps:$4 sm:$0xff]   ;;  %v333_v7 = vpack.c.bf16 %v771_v5, %v770_v4  ;;  %v779_v8 = vld [vmem:[%s167_s11 + $0x20] sm:$0xff]  ;;  %v788_v11 = vld [vmem:[%s167_s11 + $0x30] sm:$0xff]  ;;  %s1193_s20 = scalar_lea.vmem [#allocation5], %s876_s19  ;;  %p1280_p11 = scmp.ne.s32.totalorder %s1277_s24, 0 }
  0x3b   : > { %828 = vmatprep.subr.bf16.mxu0 %v200_v2  ;;  %v780_v9 = vld [vmem:[%s167_s11 + $0x28] sm:$0xff]  ;;  %v789_v12 = vld [vmem:[%s167_s11 + $0x38] sm:$0xff]  ;;  %v930_v14 = vld [vmem:[%s1271_s1] sm:$0xff]   ;;  %s681_s26 = sshll.u32 %s1193_s20, 4  ;;  %s1220_s29 = scalar_lea.hbm %s1273_s3, %s877_s22  ;;  %s1222_s26 = int_to_ptr.vmem [resolvable:$true] %s681_s26 }
  0x3c   : > { %829 = vmatpush3.bf16.msra.mxu0 %v200_v2  ;;  %v445_v10 = vpack.c.bf16 %v780_v9, %v779_v8  ;;  %v557_v13 = vpack.c.bf16 %v789_v12, %v788_v11  ;;  %834 = vmatprep.subr.bf16.mxu1 %v930_v14  ;;  %s961_s30 = scalar_lea.vmem %s1222_s26, 1536  ;;  %s1032_s9 = smov [#allocation5]  }
  0x3d   : > { %840 = vmatprep.subr.bf16.mxu0 %v333_v7  ;;  %835 = vmatpush3.bf16.msra.mxu1 %v930_v14  ;;  %p962_p6 = scmp.ne.s32.totalorder %s1222_s26, %s961_s30  ;;  %s965_s10 = sshll.u32 %s1032_s9, 4  ;;  %s966_s10 = int_to_ptr.vmem [resolvable:$false] %s965_s10 }
  0x3e   : > { %846 = vmatprep.subr.bf16.mxu1 %v930_v14  ;;  %s967_s11 = scalar_lea.vmem %s966_s10, 3072  ;;  %p968_p8 = scmp.lt.s32.totalorder %s1222_s26, %s966_s10 }
  0x3f   : > { %831 = vmatmul.mubr.msk.bf16.vlgmr.msra.gmra.mrb[0].mxu0 %vm209_vm0, %v929_v6  ;;  %p963_p12 = pnand %p962_p6, %p1280_p11  ;;  %p969_p10 = scmp.lt.s32.totalorder %s967_s11, %s961_s30 }
  0x40   : > { %841 = vmatpush3.bf16.msra.mxu0 %v333_v7  ;;  %842 = vmatprep.mubr.msk.bf16.mxu0 %vm209_vm0, %v928_v3 }
  0x41   : > { %852 = vmatprep.subr.bf16.mxu0 %v445_v10  ;;  %p964_p13 = pneg %p963_p12  ;;  %p970_p0 = por %p969_p10, %p968_p8 }
  0x43   : > { %p971_p2 = pnand %p970_p0, %p964_p13 }
  0x47   : > { %843 = vmatmul.mubr.msk.bf16.vlgmr.msra.gmra.mrb[4].mxu0 %vm209_vm0, %v929_v6 }
  0x48   : > { %853 = vmatpush3.bf16.msra.mxu0 %v445_v10  ;;  %854 = vmatprep.mubr.msk.bf16.mxu0 %vm209_vm0, %v928_v3 }
  0x49   : > { %864 = vmatprep.subr.bf16.mxu0 %v557_v13 }
  0x4f   : > { %855 = vmatmul.mubr.msk.bf16.vlgmr.msra.gmra.mrb[8].mxu0 %vm209_vm0, %v929_v6 }
  0x50   : > { %865 = vmatpush3.bf16.msra.mxu0 %v557_v13  ;;  %866 = vmatprep.mubr.msk.bf16.mxu0 %vm209_vm0, %v928_v3 }
  0x57   : > { %867 = vmatmul.mubr.msk.bf16.vlgmr.msra.gmra.mrb[12].mxu0 %vm209_vm0, %v929_v6 }
 0x112   : > { %v832_v15 = vpop.f32.mrb[0].mxu0 }
 0x113   : > { %v250_v16 = vpop.f32.mrb[1].mxu0  ;;  %v265_v20 = vpack.c.bf16 %v832_v15, %v832_v15 }
 0x114   : > { %v833_v17 = vpop.f32.mrb[2].mxu0 }
 0x115   : > { %v253_v18 = vpop.f32.mrb[3].mxu0 }
 0x116   : > { %v264_v19 = vpack.c.bf16 %v253_v18, %v250_v16 }
 0x118   : > { %836 = vmatprep.mubr.msk.bf16.mxu1 %vm209_vm0, %v264_v19 }
 0x119   : > { %837 = vmatmul.mubr.msk.bf16.vlgmr.msra.gmra.mrb[0].mxu1 %vm209_vm0, %v265_v20 }
 0x11a   : > { %v844_v21 = vpop.f32.mrb[4].mxu0  ;;  %847 = vmatpush3.bf16.msra.mxu1 %v930_v14 }
 0x11b   : > { %v368_v22 = vpop.f32.mrb[5].mxu0  ;;  %858 = vmatprep.subr.bf16.mxu1 %v930_v14  ;;  %v383_v26 = vpack.c.bf16 %v844_v21, %v844_v21 }
 0x11c   : > { %v845_v23 = vpop.f32.mrb[6].mxu0 }
 0x11d   : > { %v371_v24 = vpop.f32.mrb[7].mxu0 }
 0x11e   : > { %v382_v25 = vpack.c.bf16 %v371_v24, %v368_v22 }
 0x120   : > { %848 = vmatprep.mubr.msk.bf16.mxu1 %vm209_vm0, %v382_v25 }
 0x121   : > { %849 = vmatmul.mubr.msk.bf16.vlgmr.msra.gmra.mrb[4].mxu1 %vm209_vm0, %v383_v26 }
 0x122   : > { %v856_v27 = vpop.f32.mrb[8].mxu0  ;;  %859 = vmatpush3.bf16.msra.mxu1 %v930_v14 }
 0x123   : > { %v480_v28 = vpop.f32.mrb[9].mxu0  ;;  %870 = vmatprep.subr.bf16.mxu1 %v930_v14  ;;  %v495_v32 = vpack.c.bf16 %v856_v27, %v856_v27 }
 0x124   : > { %v857_v29 = vpop.f32.mrb[10].mxu0 }
 0x125   : > { %v483_v30 = vpop.f32.mrb[11].mxu0 }
 0x126   : > { %v494_v31 = vpack.c.bf16 %v483_v30, %v480_v28 }
 0x128   : > { %860 = vmatprep.mubr.msk.bf16.mxu1 %vm209_vm0, %v494_v31 }
 0x129   : > { %861 = vmatmul.mubr.msk.bf16.vlgmr.msra.gmra.mrb[8].mxu1 %vm209_vm0, %v495_v32 }
 0x12a   : > { %v868_v33 = vpop.f32.mrb[12].mxu0  ;;  %871 = vmatpush3.bf16.msra.mxu1 %v930_v14 }
 0x12b   : > { %v592_v34 = vpop.f32.mrb[13].mxu0  ;;  %v607_v38 = vpack.c.bf16 %v868_v33, %v868_v33 }
 0x12c   : > { %v869_v35 = vpop.f32.mrb[14].mxu0 }
 0x12d   : > { %v595_v36 = vpop.f32.mrb[15].mxu0 }
 0x12e   : > { %v606_v37 = vpack.c.bf16 %v595_v36, %v592_v34 }
 0x130   : > { %872 = vmatprep.mubr.msk.bf16.mxu1 %vm209_vm0, %v606_v37 }
 0x131   : > { %873 = vmatmul.mubr.msk.bf16.vlgmr.msra.gmra.mrb[12].mxu1 %vm209_vm0, %v607_v38 }
 0x1ec   : > { %v838_v39 = vpop.f32.mrb[0].mxu1 }
 0x1ed   : > { %329 = vst.msk [vmem:[%s1193_s20 + $0x10] sm:$0xff] %vm326_vm1, %v838_v39  ;;  %v312_v40 = vpop.f32.mrb[1].mxu1 }
 0x1ee   : > { %327 = vst.msk [vmem:[%s1193_s20] sm:$0xff] %vm326_vm1, %v312_v40  ;;  %v839_v41 = vpop.f32.mrb[2].mxu1 }
 0x1ef   : > { %v315_v42 = vpop.f32.mrb[3].mxu1 }
 0x1f0   : > { %328 = vst.msk [vmem:[%s1193_s20 + $0x8] sm:$0xff] %vm326_vm1, %v315_v42 }
 0x1f4   : > { %v850_v43 = vpop.f32.mrb[4].mxu1 }
 0x1f5   : > { %778 = vst.msk [vmem:[%s1193_s20 + $0x28] sm:$0xff] %vm326_vm1, %v850_v43  ;;  %v424_v44 = vpop.f32.mrb[5].mxu1 }
 0x1f6   : > { %776 = vst.msk [vmem:[%s1193_s20 + $0x18] sm:$0xff] %vm326_vm1, %v424_v44  ;;  %v851_v45 = vpop.f32.mrb[6].mxu1 }
 0x1f7   : > { %v427_v46 = vpop.f32.mrb[7].mxu1 }
 0x1f8   : > { %777 = vst.msk [vmem:[%s1193_s20 + $0x20] sm:$0xff] %vm326_vm1, %v427_v46 }
 0x1fc   : > { %v862_v47 = vpop.f32.mrb[8].mxu1 }
 0x1fd   : > { %787 = vst.msk [vmem:[%s1193_s20 + $0x40] sm:$0xff] %vm326_vm1, %v862_v47  ;;  %v536_v48 = vpop.f32.mrb[9].mxu1 }
 0x1fe   : > { %785 = vst.msk [vmem:[%s1193_s20 + $0x30] sm:$0xff] %vm326_vm1, %v536_v48  ;;  %v863_v49 = vpop.f32.mrb[10].mxu1 }
 0x1ff   : > { %v539_v50 = vpop.f32.mrb[11].mxu1 }
 0x200   : > { %786 = vst.msk [vmem:[%s1193_s20 + $0x38] sm:$0xff] %vm326_vm1, %v539_v50 }
 0x204   : > { %v874_v51 = vpop.f32.mrb[12].mxu1 }
 0x205   : > { %796 = vst.msk [vmem:[%s1193_s20 + $0x58] sm:$0xff] %vm326_vm1, %v874_v51  ;;  %v648_v52 = vpop.f32.mrb[13].mxu1 }
 0x206   : > { %794 = vst.msk [vmem:[%s1193_s20 + $0x48] sm:$0xff] %vm326_vm1, %v648_v52  ;;  %v875_v53 = vpop.f32.mrb[14].mxu1 }
 0x207   : > { %v651_v54 = vpop.f32.mrb[15].mxu1 }
 0x208   : > { %795 = vst.msk [vmem:[%s1193_s20 + $0x50] sm:$0xff] %vm326_vm1, %v651_v54 }
 0x209   : > { %974 = shalt.err (!%p971_p2)
}
 0x20a   : > { %s975_s4 = scalar_lea.hbm %s1220_s29, 1536  ;;  %s979_s8 = scalar_lea.hbm %s1273_s3, 3072 }
 0x20b   : > { %p976_p4 = scmp.ne.s32.totalorder %s1220_s29, %s975_s4  ;;  %p980_p9 = scmp.lt.u32.totalorder %s1220_s29, %s1273_s3 }
 0x20c   : > { %p981_p1 = scmp.lt.u32.totalorder %s979_s8, %s975_s4  ;;  %p983_p6 = scmp.lt.u32.totalorder %s975_s4, %s1220_s29 }
 0x20d   : > { %p977_p5 = pnand %p976_p4, %p1280_p11 }
 0x20e   : > { %p982_p3 = por %p981_p1, %p980_p9 }
 0x20f   : > { %p978_p7 = pneg %p977_p5 }
 0x210   : > { %p984_p12 = por %p983_p6, %p982_p3 }
 0x212   : > { %p985_p13 = pnand %p984_p12, %p978_p7 }
 0x214   : > { %988 = shalt.err (!%p985_p13)
}
 0x215   : > { %s1033_s19 = smov 128   ;;  %s1034_s20 = smov 8  }
 0x216   : > { %880 = dma.vmem_to_hbm [thread:$0]  (%p1280_p11), %s1222_s26, 1536, %s1220_s29, %s667_s16, %s1033_s19, %s1033_s19, %s1034_s20  }
 0x217 PF: > { %s696_s22 = sand.u32 1, %s1015_s12   ;;  %p1281_p8 = scmp.ne.s32.totalorder %s1278_s25, 0 }
 0x218   : > { %p1282_p10 = scmp.ge.s32.totalorder %s1027_s15, 2  ;;  %s697_s27 = scalar_lea.sflag [#allocation4], %s696_s22 }
 0x21a   : > { %p887_p0 = pnand %p1282_p10, %p1281_p8 }
 0x21c   : > { %1010 = dma.done.wait (!%p887_p0), %s697_s27, 1536  }
 0x21d   : > { %1012 = vsyncadd (!%p887_p0), %s697_s27, 4294965760  ;;  %p16_p2 = scmp.ge.s32.totalorder %s1080_s18, 4   ;;  %s1283_s12 = smov %s1019_s13 }
 0x21e   : > { %s1284_s13 = smov %s1023_s14  ;;  %s1285_s14 = smov %s1092_s21 }
 0x21f   : > { %s1286_s15 = smov %s1080_s18  ;;  %18 = sbr.rel (!%p16_p2) target bundleno = 5 (0x5), region = 83 }
 0x226   :  { %702 = vsyncpa [#allocation3], 1 }
 0x227   :  { %704 = vsyncpa [#allocation3 + $0x1], 1 }
 0x228   :  { %705 = vsyncpa [#allocation4], 1 }
 0x229   :  { %707 = vsyncpa [#allocation4 + $0x1], 1 }

</bundles_post_ra>
